<compile_context>
chip_gen: v7x
topology: tpu7x:2x2x1
jax: 0.10.0
libtpu: 0.0.40
codegen_flags: <defaults>
</compile_context>

<pallas_src>
import jax
import jax.numpy as jnp
from jax.experimental import pallas as pl
from jax.experimental.pallas import tpu as pltpu

IN_DIM = 100
HID_DIM = 200
OUT_DIM = 10

# Lane / MXU aligned padded dims (last dim multiples of 128).
HID_PAD = 256
OUT_PAD = 128

MAX_TILE_B = 1024     # upper bound on batch tile (multiple of 128)
NEG_BIG = -1e30       # f32 bias for padded logit columns -> exp() == 0


def mlp_softmax_kernel(x_ref, w1_ref, b1_ref, w2_ref, b2_ref, o_ref):
    # x arrives as f32 (no wrapper pre-cast pass); cast to bf16 at the MXU.
    x = x_ref[...].astype(jnp.bfloat16)

    # Linear 1: bf16 x bf16 -> f32 accumulation; bias + ReLU in f32.
    h = jnp.dot(x, w1_ref[...], preferred_element_type=jnp.float32)
    h = jnp.maximum(h + b1_ref[...], 0.0)

    # Linear 2: bf16 x bf16 -> f32 accumulation (single-pass MXU path).
    logits = jnp.dot(h.astype(jnp.bfloat16), w2_ref[...],
                     preferred_element_type=jnp.float32)
    logits = logits + b2_ref[...]          # padded classes carry -1e30 (f32)

    # Numerically stable softmax over the (padded) class axis.
    m = jnp.max(logits, axis=-1, keepdims=True)
    e = jnp.exp(logits - m)
    denom = jnp.sum(e, axis=-1, keepdims=True)
    probs = e * pl.reciprocal(denom, approx=True)      # EUP vrcp, ~free slot

    # Store transposed (classes, batch) in bf16: batch on the lane dim keeps
    # stores unmasked/dense; the 10 real classes become contiguous rows.
    o_ref[...] = probs.T.astype(o_ref.dtype)


def _round_up(n, m):
    return ((n + m - 1) // m) * m


def _pick_batch_tile(B, max_tb=MAX_TILE_B):
    """Return (tile_b, padded_B).

    Small B -> single grid step padded only to a multiple of 16.
    Large B -> tile is a multiple of 128 (lane dim of the transposed output),
    tail over-padding kept <= ~12.5% of B, and >= 4 grid steps when possible
    so v7x's two TensorCores both get work and the pipeline has depth.
    """
    bp16 = _round_up(B, 16)
    if bp16 <= max_tb:
        return bp16, bp16
    tb = max_tb
    while tb > 128 and (_round_up(B, tb) - B) * 8 > B:      # >12.5% waste
        tb //= 2
    while tb > 256 and (_round_up(B, tb) // tb) < 4:        # want >=4 steps
        tb //= 2
    return tb, _round_up(B, tb)


def my_custom_model_forward(x, w1, b1, w2, b2):
    """x: (B, 100) f32; weights in (in, out) layout -> (B, 10) f32 softmax."""
    B = x.shape[0]

    # One-time layout prep (constant-folded under jit for static params).
    w1_p = jnp.pad(w1, ((0, 0), (0, HID_PAD - HID_DIM))).astype(jnp.bfloat16)
    b1_p = jnp.pad(b1, ((0, 0), (0, HID_PAD - HID_DIM)))                 # f32
    w2_p = jnp.pad(w2, ((0, HID_PAD - HID_DIM),
                        (0, OUT_PAD - OUT_DIM))).astype(jnp.bfloat16)
    b2_p = jnp.pad(b2, ((0, 0), (0, OUT_PAD - OUT_DIM)),
                   constant_values=NEG_BIG)                              # f32

    # Batch tiling with bounded tail padding; x stays f32 (cast in-kernel).
    tb, Bp = _pick_batch_tile(B)
    x_p = x if Bp == B else jnp.pad(x, ((0, Bp - B), (0, 0)))

    grid = (Bp // tb,)

    out_t = pl.pallas_call(
        mlp_softmax_kernel,
        out_shape=jax.ShapeDtypeStruct((OUT_PAD, Bp), jnp.bfloat16),
        grid=grid,
        in_specs=[
            pl.BlockSpec((tb, IN_DIM), lambda i: (i, 0)),        # x: streamed
            pl.BlockSpec((IN_DIM, HID_PAD), lambda i: (0, 0)),   # VMEM-resident
            pl.BlockSpec((1, HID_PAD), lambda i: (0, 0)),
            pl.BlockSpec((HID_PAD, OUT_PAD), lambda i: (0, 0)),
            pl.BlockSpec((1, OUT_PAD), lambda i: (0, 0)),
        ],
        out_specs=pl.BlockSpec((OUT_PAD, tb), lambda i: (0, i)),  # lane-dense
        compiler_params=pltpu.CompilerParams(
            dimension_semantics=("parallel",)),
    )(x_p, w1_p, b1_p, w2_p, b2_p)

    # Only the 10 real (contiguous) class rows are read back; tiny transpose.
    return out_t[:OUT_DIM, :B].T.astype(jnp.float32)


def init_params(key):
    """Deterministic init mimicking PyTorch Linear: U(-1/sqrt(fan_in), ...)."""
    k1, k2, k3, k4 = jax.random.split(key, 4)
    bound1 = 1.0 / (IN_DIM ** 0.5)
    bound2 = 1.0 / (HID_DIM ** 0.5)
    w1 = jax.random.uniform(k1, (IN_DIM, HID_DIM), jnp.float32, -bound1, bound1)
    b1 = jax.random.uniform(k2, (1, HID_DIM), jnp.float32, -bound1, bound1)
    w2 = jax.random.uniform(k3, (HID_DIM, OUT_DIM), jnp.float32, -bound2, bound2)
    b2 = jax.random.uniform(k4, (1, OUT_DIM), jnp.float32, -bound2, bound2)
    return w1, b1, w2, b2


def reference_forward(x, w1, b1, w2, b2):
    h = jnp.maximum(x @ w1 + b1, 0.0)
    logits = h @ w2 + b2
    return jax.nn.softmax(logits, axis=-1)


if __name__ == "__main__":
    key = jax.random.PRNGKey(0)
    kx, kp, kx2 = jax.random.split(key, 3)
    w1, b1, w2, b2 = init_params(kp)
    fwd = jax.jit(my_custom_model_forward)

    # Small batch (single-tile grid).
    B = 8
    x = jax.random.normal(kx, (B, IN_DIM), dtype=jnp.float32)
    out = jax.block_until_ready(fwd(x, w1, b1, w2, b2))
    ref = reference_forward(x, w1, b1, w2, b2)
    assert out.shape == (B, OUT_DIM)
    assert jnp.allclose(out, ref, atol=2e-2, rtol=2e-2)        # bf16 path
    assert jnp.allclose(jnp.sum(out, axis=-1), 1.0, atol=5e-3)  # bf16 rounding

    # Larger, tile-misaligned batch: multi-step grid + bounded tail padding.
    B2 = 1040
    x2 = jax.random.normal(kx2, (B2, IN_DIM), dtype=jnp.float32)
    out2 = jax.block_until_ready(fwd(x2, w1, b1, w2, b2))
    ref2 = reference_forward(x2, w1, b1, w2, b2)
    assert out2.shape == (B2, OUT_DIM)
    assert jnp.allclose(out2, ref2, atol=2e-2, rtol=2e-2)
    assert jnp.allclose(jnp.sum(out2, axis=-1), 1.0, atol=5e-3)

    print("KERNEL_OK")
</pallas_src>

<mosaic_0001>
module attributes {stable_mosaic.version = 11 : i64} {
  func.func @mlp_softmax_kernel(%arg0: i32, %arg1: memref<16x100xf32, #tpu.memory_space<vmem>>, %arg2: memref<100x256xbf16, #tpu.memory_space<vmem>>, %arg3: memref<1x256xf32, #tpu.memory_space<vmem>>, %arg4: memref<256x128xbf16, #tpu.memory_space<vmem>>, %arg5: memref<1x128xf32, #tpu.memory_space<vmem>>, %arg6: memref<128x16xbf16, #tpu.memory_space<vmem>>) attributes {dimension_semantics = [#tpu.dimension_semantics<parallel>], iteration_bounds = array<i64: 1>, scalar_prefetch = 0 : i64, scratch_operands = 0 : i64, tpu.core_type = #tpu.core_type<tc>, window_params = [{transform_indices = @transform_0, window_bounds = array<i64: 16, 100>}, {pipeline_mode = #tpu.pipeline_mode<synchronous>, transform_indices = @transform_1, window_bounds = array<i64: 100, 256>}, {pipeline_mode = #tpu.pipeline_mode<synchronous>, transform_indices = @transform_2, window_bounds = array<i64: 1, 256>}, {pipeline_mode = #tpu.pipeline_mode<synchronous>, transform_indices = @transform_3, window_bounds = array<i64: 256, 128>}, {pipeline_mode = #tpu.pipeline_mode<synchronous>, transform_indices = @transform_4, window_bounds = array<i64: 1, 128>}, {transform_indices = @transform_5, window_bounds = array<i64: 128, 16>}]} {
    %c0 = arith.constant 0 : index
    %c0_0 = arith.constant 0 : index
    %0 = vector.load %arg1[%c0, %c0_0] : memref<16x100xf32, #tpu.memory_space<vmem>>, vector<16x100xf32>
    %1 = arith.truncf %0 : vector<16x100xf32> to vector<16x100xbf16>
    %c0_1 = arith.constant 0 : index
    %c0_2 = arith.constant 0 : index
    %2 = vector.load %arg2[%c0_1, %c0_2] : memref<100x256xbf16, #tpu.memory_space<vmem>>, vector<100x256xbf16>
    %cst = arith.constant dense<0.000000e+00> : vector<16x256xf32>
    %3 = tpu.matmul %1, %2, %cst {dimension_numbers = #tpu.dot_dimension_numbers<[1], [0], [0], [1], [0, 0, 1, 1], [], []>} : vector<16x100xbf16>, vector<100x256xbf16>, vector<16x256xf32> -> vector<16x256xf32>
    %c0_3 = arith.constant 0 : index
    %c0_4 = arith.constant 0 : index
    %4 = vector.load %arg3[%c0_3, %c0_4] : memref<1x256xf32, #tpu.memory_space<vmem>>, vector<1x256xf32>
    %5 = vector.broadcast %4 : vector<1x256xf32> to vector<16x256xf32>
    %6 = arith.addf %3, %5 : vector<16x256xf32>
    %cst_5 = arith.constant 0.000000e+00 : f32
    %7 = vector.broadcast %cst_5 : f32 to vector<16x256xf32>
    %8 = arith.maximumf %6, %7 : vector<16x256xf32>
    %9 = arith.truncf %8 : vector<16x256xf32> to vector<16x256xbf16>
    %c0_6 = arith.constant 0 : index
    %c0_7 = arith.constant 0 : index
    %10 = vector.load %arg4[%c0_6, %c0_7] : memref<256x128xbf16, #tpu.memory_space<vmem>>, vector<256x128xbf16>
    %cst_8 = arith.constant dense<0.000000e+00> : vector<16x128xf32>
    %11 = tpu.matmul %9, %10, %cst_8 {dimension_numbers = #tpu.dot_dimension_numbers<[1], [0], [0], [1], [0, 0, 1, 1], [], []>} : vector<16x256xbf16>, vector<256x128xbf16>, vector<16x128xf32> -> vector<16x128xf32>
    %c0_9 = arith.constant 0 : index
    %c0_10 = arith.constant 0 : index
    %12 = vector.load %arg5[%c0_9, %c0_10] : memref<1x128xf32, #tpu.memory_space<vmem>>, vector<1x128xf32>
    %13 = vector.broadcast %12 : vector<1x128xf32> to vector<16x128xf32>
    %14 = arith.addf %11, %13 : vector<16x128xf32>
    %cst_11 = arith.constant dense<0xFF800000> : vector<16xf32>
    %15 = vector.multi_reduction <maximumf>, %14, %cst_11 [1] : vector<16x128xf32> to vector<16xf32>
    %16 = vector.shape_cast %15 : vector<16xf32> to vector<16x1xf32>
    %17 = vector.broadcast %16 : vector<16x1xf32> to vector<16x128xf32>
    %18 = arith.subf %14, %17 : vector<16x128xf32>
    %19 = math.exp %18 : vector<16x128xf32>
    %cst_12 = arith.constant dense<0.000000e+00> : vector<16xf32>
    %20 = vector.multi_reduction <add>, %19, %cst_12 [1] : vector<16x128xf32> to vector<16xf32>
    %21 = vector.shape_cast %20 : vector<16xf32> to vector<16x1xf32>
    %22 = tpu.reciprocal %21 {approx = true} : vector<16x1xf32> -> vector<16x1xf32>
    %23 = vector.broadcast %22 : vector<16x1xf32> to vector<16x128xf32>
    %24 = arith.mulf %19, %23 : vector<16x128xf32>
    %25 = tpu.transpose %24, [1, 0] : vector<16x128xf32> -> vector<128x16xf32>
    %26 = arith.truncf %25 : vector<128x16xf32> to vector<128x16xbf16>
    %c0_13 = arith.constant 0 : index
    %c0_14 = arith.constant 0 : index
    %27 = vector.load %arg6[%c0_13, %c0_14] : memref<128x16xbf16, #tpu.memory_space<vmem>>, vector<128x16xbf16>
    tpu.vector_store %arg6[%c0_13, %c0_14], %26 {strides = array<i32>} : memref<128x16xbf16, #tpu.memory_space<vmem>>, vector<128x16xbf16>,
    return
  }
  func.func @transform_0(%arg0: i32) -> (i32, i32) {
    %c0_i32 = arith.constant 0 : i32
    %c0_i32_0 = arith.constant 0 : i32
    return %arg0, %c0_i32 : i32, i32
  }
  func.func @transform_1(%arg0: i32) -> (i32, i32) {
    %c0_i32 = arith.constant 0 : i32
    %c0_i32_0 = arith.constant 0 : i32
    %c0_i32_1 = arith.constant 0 : i32
    return %c0_i32, %c0_i32_0 : i32, i32
  }
  func.func @transform_2(%arg0: i32) -> (i32, i32) {
    %c0_i32 = arith.constant 0 : i32
    %c0_i32_0 = arith.constant 0 : i32
    %c0_i32_1 = arith.constant 0 : i32
    return %c0_i32, %c0_i32_0 : i32, i32
  }
  func.func @transform_3(%arg0: i32) -> (i32, i32) {
    %c0_i32 = arith.constant 0 : i32
    %c0_i32_0 = arith.constant 0 : i32
    %c0_i32_1 = arith.constant 0 : i32
    return %c0_i32, %c0_i32_0 : i32, i32
  }
  func.func @transform_4(%arg0: i32) -> (i32, i32) {
    %c0_i32 = arith.constant 0 : i32
    %c0_i32_0 = arith.constant 0 : i32
    %c0_i32_1 = arith.constant 0 : i32
    return %c0_i32, %c0_i32_0 : i32, i32
  }
  func.func @transform_5(%arg0: i32) -> (i32, i32) {
    %c0_i32 = arith.constant 0 : i32
    %c0_i32_0 = arith.constant 0 : i32
    return %c0_i32, %arg0 : i32, i32
  }
}

</mosaic_0001>

<bundles_post_ra>
// kernel: my_custom_model_forward.1
= control target key start
LH: loop header
LB: loop body
LE: loop exit
PB: predicated region body
PF: predicated region fallthrough
CT: control target
= control target key end

     0   :  { %v618_v1 = vmov 0   ;;  %vm118_vm0 = vcmask 1041408   ;;  %vm114_vm1 = vcmask 818176   ;;  %v39_v36 = vlaneseq  ;;  %s812_s1 = inlined_call_operand.vmem [shape: bf16[100,256], index: 1, kind: input, shape index: {}]   ;;  %s813_s3 = inlined_call_operand.vmem [shape: bf16[256,128], index: 3, kind: input, shape index: {}]   ;;  %s814_s0 = inlined_call_operand.vmem [shape: f32[16,100], index: 0, kind: input, shape index: {}]   ;;  %s815_s2 = inlined_call_operand.vmem [shape: f32[1,256], index: 2, kind: input, shape index: {}]   ;;  %s816_s4 = inlined_call_operand.vmem [shape: f32[1,128], index: 4, kind: input, shape index: {}]   ;;  %s817_s5 = inlined_call_operand.vmem [shape: bf16[128,16], index: 5, kind: output, shape index: {}]  }
   0x1   :  { %v574_v0 = vld [vmem:[%s812_s1 + $0x4] ss:$8 sps:$4 sm:$0xff]   ;;  %157 = vmatprep.mubr.bf16.mxu0 %v618_v1  ;;  %v576_v2 = vld [vmem:[%s812_s1] ss:$8 sps:$4 sm:$0xff]   ;;  %v577_v3 = vld [vmem:[%s812_s1 + $0x14] ss:$8 sps:$4 sm:$0xff]  }
   0x2   :  { %125 = vmatprep.subr.bf16.mxu0 %v574_v0  ;;  %v579_v4 = vld [vmem:[%s812_s1 + $0x10] ss:$8 sps:$4 sm:$0xff]   ;;  %v580_v5 = vld [vmem:[%s812_s1 + $0x24] ss:$8 sps:$4 sm:$0xff]   ;;  %v582_v6 = vld [vmem:[%s812_s1 + $0x20] ss:$8 sps:$4 sm:$0xff]  }
   0x3   :  { %126 = vmatpush1.bf16.msra.mxu0 %v576_v2  ;;  %v583_v7 = vld [vmem:[%s812_s1 + $0x34] ss:$8 sps:$4 sm:$0xff]   ;;  %v585_v8 = vld [vmem:[%s812_s1 + $0x30] ss:$8 sps:$4 sm:$0xff]   ;;  %v594_v9 = vld [vmem:[%s813_s3 + $0x40] sm:$0xff]   ;;  %v40_v37 = vshrl.u32 %v39_v36, 7 }
   0x4   :  { %127 = vmatprep.subr.bf16.mxu0 %v577_v3  ;;  %v586_v10 = vld [vmem:[%s812_s1 + $0x44] ss:$8 sps:$4 sm:$0xff]   ;;  %550 = vmatprep.subr.bf16.mxu1 %v594_v9  ;;  %v588_v14 = vld [vmem:[%s812_s1 + $0x40] ss:$8 sps:$4 sm:$0xff]   ;;  %v598_v15 = vld [vmem:[%s813_s3 + $0x50] sm:$0xff]   ;;  %vm464_vm2 = vcmask 125952  }
   0x5   :  { %v595_v11 = vld [vmem:[%s813_s3] sm:$0xff]   ;;  %v596_v12 = vld [vmem:[%s813_s3 + $0x48] sm:$0xff]   ;;  %v589_v16 = vld [vmem:[%s812_s1 + $0x54] ss:$8 sps:$4 sm:$0xff]   ;;  %v41_v38 = vsub.s32 0, %v40_v37  ;;  %v45_v40 = vsub.s32 1, %v40_v37 }
   0x6   :  { %551 = vmatpush3.bf16.msra.mxu1 %v595_v11  ;;  %v597_v13 = vld [vmem:[%s813_s3 + $0x8] sm:$0xff]   ;;  %v36_v17 = vld [vmem:[%s812_s1 + $0x60] sm:$0x33]  ;;  %v599_v18 = vld [vmem:[%s813_s3 + $0x10] sm:$0xff]  }
   0x7   :  { %128 = vmatpush1.bf16.msra.mxu0 %v579_v4  ;;  %552 = vmatprep.subr.bf16.mxu1 %v596_v12  ;;  %v600_v19 = vld [vmem:[%s813_s3 + $0x58] sm:$0xff]   ;;  %v498_v22 = vcombine.high %v36_v17, %v36_v17  ;;  %v497_v23 = vcombine.low %v36_v17, %v36_v17  ;;  %v602_v24 = vld [vmem:[%s813_s3 + $0x60] sm:$0xff]   ;;  %v22_v26 = vld [vmem:[%s814_s0 + $0x8] sm:$0xff] }
   0x8   :  { %129 = vmatprep.subr.bf16.mxu0 %v580_v5  ;;  %v591_v20 = vld [vmem:[%s812_s1 + $0x50] ss:$8 sps:$4 sm:$0xff]   ;;  %v21_v25 = vld [vmem:[%s814_s0] sm:$0xff]  ;;  %v604_v29 = vld [vmem:[%s813_s3 + $0x68] sm:$0xff]  }
   0x9   :  { %v601_v21 = vld [vmem:[%s813_s3 + $0x18] sm:$0xff]   ;;  %v120_v27 = vsel %vm118_vm0, %v497_v23, 0  ;;  %v603_v28 = vld [vmem:[%s813_s3 + $0x20] sm:$0xff]   ;;  %v23_v30 = vpack.c.bf16 %v22_v26, %v21_v25  ;;  %v605_v31 = vld [vmem:[%s813_s3 + $0x28] sm:$0xff]  }
   0xa   :  { %553 = vmatpush3.bf16.msra.mxu1 %v597_v13  ;;  %v606_v32 = vld [vmem:[%s813_s3 + $0x70] sm:$0xff]   ;;  %v608_v34 = vld [vmem:[%s813_s3 + $0x78] sm:$0xff]   ;;  %v37_v39 = vld [vmem:[%s815_s2] sm:$0x3] }
   0xb   :  { %130 = vmatpush1.bf16.msra.mxu0 %v582_v6  ;;  %554 = vmatprep.subr.bf16.mxu1 %v598_v15  ;;  %v607_v33 = vld [vmem:[%s813_s3 + $0x30] sm:$0xff]   ;;  %v609_v35 = vld [vmem:[%s813_s3 + $0x38] sm:$0xff]   ;;  %v42_v41 = vrot.slane %v37_v39, %v41_v38  ;;  %v46_v42 = vrot.slane %v37_v39, %v45_v40  ;;  %v501_v59 = vld [vmem:[%s816_s4] ss:$0 sm:$0xff] }
   0xc   :  { %131 = vmatprep.subr.bf16.mxu0 %v583_v7 }
   0xe   :  { %555 = vmatpush3.bf16.msra.mxu1 %v599_v18 }
   0xf   :  { %132 = vmatpush1.bf16.msra.mxu0 %v585_v8  ;;  %556 = vmatprep.subr.bf16.mxu1 %v600_v19 }
  0x10   :  { %133 = vmatprep.subr.bf16.mxu0 %v586_v10 }
  0x12   :  { %557 = vmatpush3.bf16.msra.mxu1 %v601_v21 }
  0x13   :  { %134 = vmatpush1.bf16.msra.mxu0 %v588_v14  ;;  %558 = vmatprep.subr.bf16.mxu1 %v602_v24 }
  0x14   :  { %135 = vmatprep.subr.bf16.mxu0 %v589_v16 }
  0x16   :  { %559 = vmatpush3.bf16.msra.mxu1 %v603_v28 }
  0x17   :  { %136 = vmatpush1.bf16.msra.mxu0 %v591_v20  ;;  %560 = vmatprep.subr.bf16.mxu1 %v604_v29 }
  0x18   :  { %499 = vmatprep.subr.msk.bf16.mxu0 %vm118_vm0, %v498_v22 }
  0x1a   :  { %561 = vmatpush3.bf16.msra.mxu1 %v605_v31 }
  0x1b   :  { %138 = vmatpush1.bf16.msra.mxu0 %v120_v27  ;;  %562 = vmatprep.subr.bf16.mxu1 %v606_v32 }
  0x1e   :  { %500 = vmatmul.mubr.msk.bf16.vlgmr.msra.gmra.mrb[0].mxu0 %vm114_vm1, %v23_v30  ;;  %563 = vmatpush3.bf16.msra.mxu1 %v607_v33 }
  0x1f   :  { %564 = vmatprep.subr.bf16.mxu1 %v608_v34 }
  0x22   :  { %565 = vmatpush3.bf16.msra.mxu1 %v609_v35 }
  0xf1   :  { %v159_v43 = vpop.f32.mrb[0].mxu0 }
  0xf2   :  { %v160_v44 = vadd.f32 %v159_v43, %v42_v41  ;;  %v161_v45 = vpop.f32.mrb[1].mxu0 }
  0xf3   :  { %v162_v46 = vadd.f32 %v161_v45, %v46_v42  ;;  %v163_v47 = vpop.f32.mrb[2].mxu0 }
  0xf4   :  { %v164_v48 = vadd.f32 %v163_v47, %v42_v41  ;;  %v165_v49 = vpop.f32.mrb[3].mxu0  ;;  %v168_v51 = vmax.f32 %v160_v44, 0.0 }
  0xf5   :  { %v166_v50 = vadd.f32 %v165_v49, %v46_v42  ;;  %v169_v53 = vmax.f32 %v162_v46, 0.0 }
  0xf6   :  { %v170_v52 = vmax.f32 %v164_v48, 0.0 }
  0xf7   :  { %v171_v54 = vmax.f32 %v166_v50, 0.0 }
  0xf8   :  { %v172_v55 = vpack.c.bf16 %v170_v52, %v168_v51 }
  0xf9   :  { %v173_v56 = vpack.c.bf16 %v171_v54, %v169_v53 }
  0xfb   :  { %341 = vmatprep.mubr.bf16.mxu1 %v173_v56 }
  0xfc   :  { %342 = vmatmul.mubr.bf16.vlgmr.msra.gmra.mrb[0].mxu1 %v172_v55 }
 0x1cf   :  { %v566_v57 = vpop.f32.mrb[0].mxu1 }
 0x1d0   :  { %v567_v58 = vpop.f32.mrb[1].mxu1 }
 0x1d1   :  { %v568_v60 = vadd.f32 %v567_v58, %v566_v57  ;;  %v569_v61 = vpop.f32.mrb[2].mxu1 }
 0x1d2   :  { %v570_v62 = vpop.f32.mrb[3].mxu1 }
 0x1d3   :  { %v571_v63 = vadd.f32 %v570_v62, %v569_v61  ;;  %v344_v0 = vadd.f32 %v568_v60, %v501_v59 }
 0x1d5   :  { %350 = vmax.xlane.f32.xlu0 %v344_v0  ;;  %v347_v1 = vadd.f32 %v571_v63, %v501_v59 }
 0x1d9   :  { %352 = vmax.xlane.f32.xlu0 %v347_v1 }
 0x262   :  { %v351_v2 = vpop.xlane.xlu0 %350 }
 0x263   :  { %v354_v3 = vsub.f32 %v344_v0, %v351_v2 }
 0x265   :  { %v356_v4 = vmul.f32 1.442695, %v354_v3 }
 0x266   :  { %v353_v5 = vpop.xlane.xlu0 %352 }
 0x267   :  { %610 = vpow2.f32 %v356_v4  ;;  %v355_v6 = vsub.f32 %v347_v1, %v353_v5 }
 0x269   :  { %v358_v7 = vmul.f32 1.442695, %v355_v6 }
 0x26b   :  { %612 = vpow2.f32 %v358_v7 }
 0x271   :  { %v611_v8 = vpop.eup %610 }
 0x272   :  { %360 = vadd.xlane.f32.xlu1 %v611_v8 }
 0x275   :  { %v613_v9 = vpop.eup %612 }
 0x276   :  { %362 = vadd.xlane.f32.xlu1 %v613_v9 }
 0x2ff   :  { %v361_v10 = vpop.xlane.xlu1 %360 }
 0x300   :  { %614 = vrcp.f32 %v361_v10 }
 0x303   :  { %v363_v11 = vpop.xlane.xlu1 %362 }
 0x304   :  { %616 = vrcp.f32 %v363_v11 }
 0x30a   :  { %v615_v12 = vpop.eup %614 }
 0x30b   :  { %v366_v13 = vmul.f32 %v615_v12, %v611_v8 }
 0x30d   :  { %368 = vxpose.xlu0.b32.start [1/2] (short) %v366_v13, 128 }
 0x30e   :  { %v617_v14 = vpop.eup %616 }
 0x30f   :  { %v367_v15 = vmul.f32 %v617_v14, %v613_v9 }
 0x311   :  { %369 = vxpose.xlu0.b32.end [2/2] (short) %v367_v15, 128 }
 0x38d   :  { %v384_v16 = vpop.trf.xlu0 }
 0x38e   :  { %v534_v17 = vpack.c.bf16 %v384_v16, %v384_v16 }
 0x390   :  { %465 = vst.msk [vmem:[%s817_s5] sm:$0xf] %vm464_vm2, %v534_v17 }
 0x391   :  { %v385_v18 = vpop.trf.xlu0 }
 0x392   :  { %v535_v19 = vpack.c.bf16 %v385_v18, %v385_v18 }
 0x394   :  { %466 = vst.msk [vmem:[%s817_s5 + $0x4] sm:$0xf] %vm464_vm2, %v535_v19 }
 0x395   :  { %v386_v20 = vpop.trf.xlu0 }
 0x396   :  { %v536_v21 = vpack.c.bf16 %v386_v20, %v386_v20 }
 0x398   :  { %467 = vst.msk [vmem:[%s817_s5 + $0x8] sm:$0xf] %vm464_vm2, %v536_v21 }
 0x399   :  { %v387_v22 = vpop.trf.xlu0 }
 0x39a   :  { %v537_v23 = vpack.c.bf16 %v387_v22, %v387_v22 }
 0x39c   :  { %468 = vst.msk [vmem:[%s817_s5 + $0xc] sm:$0xf] %vm464_vm2, %v537_v23 }
 0x39d   :  { %v388_v24 = vpop.trf.xlu0 }
 0x39e   :  { %v538_v25 = vpack.c.bf16 %v388_v24, %v388_v24 }
 0x3a0   :  { %469 = vst.msk [vmem:[%s817_s5 + $0x10] sm:$0xf] %vm464_vm2, %v538_v25 }
 0x3a1   :  { %v389_v26 = vpop.trf.xlu0 }
 0x3a2   :  { %v539_v27 = vpack.c.bf16 %v389_v26, %v389_v26 }
 0x3a4   :  { %470 = vst.msk [vmem:[%s817_s5 + $0x14] sm:$0xf] %vm464_vm2, %v539_v27 }
 0x3a5   :  { %v390_v28 = vpop.trf.xlu0 }
 0x3a6   :  { %v540_v29 = vpack.c.bf16 %v390_v28, %v390_v28 }
 0x3a8   :  { %471 = vst.msk [vmem:[%s817_s5 + $0x18] sm:$0xf] %vm464_vm2, %v540_v29 }
 0x3a9   :  { %v391_v30 = vpop.trf.xlu0 }
 0x3aa   :  { %v541_v31 = vpack.c.bf16 %v391_v30, %v391_v30 }
 0x3ac   :  { %472 = vst.msk [vmem:[%s817_s5 + $0x1c] sm:$0xf] %vm464_vm2, %v541_v31 }
 0x3ad   :  { %v392_v32 = vpop.trf.xlu0 }
 0x3ae   :  { %v542_v33 = vpack.c.bf16 %v392_v32, %v392_v32 }
 0x3b0   :  { %473 = vst.msk [vmem:[%s817_s5 + $0x20] sm:$0xf] %vm464_vm2, %v542_v33 }
 0x3b1   :  { %v393_v34 = vpop.trf.xlu0 }
 0x3b2   :  { %v543_v35 = vpack.c.bf16 %v393_v34, %v393_v34 }
 0x3b4   :  { %474 = vst.msk [vmem:[%s817_s5 + $0x24] sm:$0xf] %vm464_vm2, %v543_v35 }
 0x3b5   :  { %v394_v36 = vpop.trf.xlu0 }
 0x3b6   :  { %v544_v37 = vpack.c.bf16 %v394_v36, %v394_v36 }
 0x3b8   :  { %475 = vst.msk [vmem:[%s817_s5 + $0x28] sm:$0xf] %vm464_vm2, %v544_v37 }
 0x3b9   :  { %v395_v38 = vpop.trf.xlu0 }
 0x3ba   :  { %v545_v39 = vpack.c.bf16 %v395_v38, %v395_v38 }
 0x3bc   :  { %476 = vst.msk [vmem:[%s817_s5 + $0x2c] sm:$0xf] %vm464_vm2, %v545_v39 }
 0x3bd   :  { %v396_v40 = vpop.trf.xlu0 }
 0x3be   :  { %v546_v41 = vpack.c.bf16 %v396_v40, %v396_v40 }
 0x3c0   :  { %477 = vst.msk [vmem:[%s817_s5 + $0x30] sm:$0xf] %vm464_vm2, %v546_v41 }
 0x3c1   :  { %v397_v42 = vpop.trf.xlu0 }
 0x3c2   :  { %v547_v43 = vpack.c.bf16 %v397_v42, %v397_v42 }
 0x3c4   :  { %478 = vst.msk [vmem:[%s817_s5 + $0x34] sm:$0xf] %vm464_vm2, %v547_v43 }
 0x3c5   :  { %v398_v44 = vpop.trf.xlu0 }
 0x3c6   :  { %v548_v45 = vpack.c.bf16 %v398_v44, %v398_v44 }
 0x3c8   :  { %479 = vst.msk [vmem:[%s817_s5 + $0x38] sm:$0xf] %vm464_vm2, %v548_v45 }
 0x3c9   :  { %v399_v46 = vpop.trf.xlu0 }
 0x3ca   :  { %v549_v47 = vpack.c.bf16 %v399_v46, %v399_v46 }
 0x3cc   :  { %480 = vst.msk [vmem:[%s817_s5 + $0x3c] sm:$0xf] %vm464_vm2, %v549_v47 }

</bundles_post_ra>
